<compile_context>
chip_gen: v6e
topology: v6e:2x2x1
jax: 0.10.0
libtpu: 0.0.40
codegen_flags: <defaults>
</compile_context>

<pallas_src>
import math

import numpy as np
import jax
import jax.numpy as jnp
from jax.experimental import pallas as pl
from jax.experimental.pallas import tpu as pltpu


def timestep_embedding_kernel(t_ref, tab_ref, w1_ref, b1_ref, w2_ref, b2_ref,
                              out_ref):
    """Fused: sinusoidal embedding -> dense -> LeakyReLU(0.2) -> dense."""
    # --- sinusoidal positional embedding ------------------------------------
    # arg[:, j] = t * freq[j] + phase[j]  (phase = 0 for sin half, pi/2 for cos
    # half), then a single EUP sin() pass over the whole (tile_b, D) tile.
    freq = tab_ref[0:1, :]                                  # (1, D) constant
    phase = tab_ref[1:2, :]                                 # (1, D) constant
    arg = t_ref[...] * freq + phase                         # (tile_b, D)
    emb = jnp.sin(arg)

    # --- MLP: dense -> LeakyReLU(0.2) -> dense -------------------------------
    # MXU inputs follow the (pre-cast) weight dtype; accumulation + bias stay f32.
    h = jnp.dot(emb.astype(w1_ref.dtype), w1_ref[...],
                preferred_element_type=jnp.float32) + b1_ref[...]
    h = jnp.maximum(h, 0.2 * h)                             # LeakyReLU(0.2)
    out = jnp.dot(h.astype(w2_ref.dtype), w2_ref[...],
                  preferred_element_type=jnp.float32) + b2_ref[...]
    out_ref[...] = out.astype(out_ref.dtype)


def _pick_tile_b(B, D, H, O, *, cap=2048, vmem_budget_bytes=24 << 20):
    """Batch tile: largest multiple-of-8 divisor of B under a VMEM-derived cap.

    - cap raised to 2048: one batch row costs ~4*(D + H + 2*O) bytes of f32
      activations, so multi-thousand-row tiles fit under even v7x's 32 MiB
      scoped-VMEM default and amortize the ~0.35 us per-grid-step overhead.
    - for B >= 16 the cap is also limited to ceil(B/2) (rounded up to 8) so
      the grid has at least 2 steps and the "parallel" batch axis can shard
      across v7x's two TensorCores.
    """
    row_bytes = 4 * (D + H + 2 * O + 2)      # emb + hidden + (double-buffered) out + t
    cap = min(cap, max(8, vmem_budget_bytes // row_bytes))
    if B >= 16:
        cap = min(cap, max(8, ((B // 2 + 7) // 8) * 8))
    best = None
    tb = 8
    limit = min(cap, B)
    while tb <= limit:
        if B % tb == 0:
            best = tb
        tb += 8
    return best if best is not None else B   # fallback: whole batch as one block


def _sinusoid_table(embedding_dim):
    """Compile-time constant (2, D) table: row 0 = freq, row 1 = phase."""
    half = embedding_dim // 2
    assert embedding_dim % 2 == 0 and half > 1, "even embedding_dim >= 4 required"
    # TODO(synk): odd embedding_dim would need a trailing zero-pad column (as in PyTorch).
    j = np.arange(half, dtype=np.float64)
    # Matches layers.get_timestep_embedding: exp(-log(10000)/(half-1) * j).
    freq_half = np.exp(-math.log(10000.0) / (half - 1) * j)
    freq = np.concatenate([freq_half, freq_half])
    phase = np.concatenate([np.zeros(half), np.full(half, np.pi / 2.0)])
    return np.stack([freq, phase]).astype(np.float32)       # (2, D)


def prepare_timestep_embedding_params(w1, b1, w2, b2, *, mxu_dtype=jnp.bfloat16):
    """One-time parameter prep (hoisted out of the per-call path).

    Weights are cast to the MXU dtype ONCE here (default bf16 on every
    generation: v5e/v6e/v7x MXUs all consume bf16 natively, and the VPU/EUP
    math in the kernel stays f32). Biases stay f32 (added post-accumulation).
    w1: (D, H), w2: (H, O) — i.e. PyTorch nn.Linear weight transposed.
    """
    D, H = w1.shape
    H2, O = w2.shape
    assert H2 == H and b1.shape == (H,) and b2.shape == (O,)
    return {
        "table": jnp.asarray(_sinusoid_table(D)),                  # (2, D) f32
        "w1": jnp.asarray(w1, mxu_dtype),                          # (D, H)
        "b1": jnp.asarray(b1, jnp.float32).reshape(1, H),
        "w2": jnp.asarray(w2, mxu_dtype),                          # (H, O)
        "b2": jnp.asarray(b2, jnp.float32).reshape(1, O),
    }


def timestep_embedding(t, params):
    """t: (B,) float timesteps; params from prepare_timestep_embedding_params.

    Returns (B, output_dim) float32.
    """
    B = t.shape[0]
    D = params["table"].shape[1]
    H = params["w1"].shape[1]
    O = params["w2"].shape[1]

    t2d = t.astype(jnp.float32).reshape(B, 1)
    tile_b = _pick_tile_b(B, D, H, O)
    grid = (B // tile_b,)
    stationary = lambda i: (0, 0)   # weights / tables stay VMEM-resident across the grid

    return pl.pallas_call(
        timestep_embedding_kernel,
        out_shape=jax.ShapeDtypeStruct((B, O), jnp.float32),
        grid=grid,
        in_specs=[
            pl.BlockSpec((tile_b, 1), lambda i: (i, 0)),   # timesteps (batch-tiled)
            pl.BlockSpec((2, D), stationary),              # freq/phase table (constant)
            pl.BlockSpec((D, H), stationary),              # W1 (pre-cast MXU dtype)
            pl.BlockSpec((1, H), stationary),              # b1 (f32)
            pl.BlockSpec((H, O), stationary),              # W2 (pre-cast MXU dtype)
            pl.BlockSpec((1, O), stationary),              # b2 (f32)
        ],
        out_specs=pl.BlockSpec((tile_b, O), lambda i: (i, 0)),
        compiler_params=pltpu.CompilerParams(
            dimension_semantics=("parallel",)),            # batch axis -> both TCs on v7x
    )(t2d, params["table"], params["w1"], params["b1"], params["w2"], params["b2"])


def reference(t, w1, b1, w2, b2):
    """Pure-JAX reference matching the PyTorch module semantics."""
    D = w1.shape[0]
    half = D // 2
    freq = jnp.exp(-math.log(10000.0) / (half - 1)
                   * jnp.arange(half, dtype=jnp.float32))
    arg = t.astype(jnp.float32)[:, None] * freq[None, :]
    emb = jnp.concatenate([jnp.sin(arg), jnp.cos(arg)], axis=1)
    h = emb @ w1 + b1
    h = jnp.where(h >= 0.0, h, 0.2 * h)
    return h @ w2 + b2


if __name__ == "__main__":
    # Small, TPU-friendly shapes implied by the module.
    embedding_dim = 128
    hidden_dim = 256
    output_dim = 128

    key = jax.random.PRNGKey(0)
    k_t, k_w1, k_b1, k_w2, k_b2, k_t2 = jax.random.split(key, 6)

    # Deterministic synthetic parameters (shapes from the nn.Linear layers).
    w1 = jax.random.normal(k_w1, (embedding_dim, hidden_dim), jnp.float32) * 0.02
    b1 = jax.random.normal(k_b1, (hidden_dim,), jnp.float32) * 0.01
    w2 = jax.random.normal(k_w2, (hidden_dim, output_dim), jnp.float32) * 0.02
    b2 = jax.random.normal(k_b2, (output_dim,), jnp.float32) * 0.01

    # ---- f32 MXU path (tight check), B=8 -> single grid step ---------------
    B = 8
    t = jax.random.uniform(k_t, (B,), jnp.float32, minval=0.0, maxval=1000.0)
    ref = reference(t, w1, b1, w2, b2)

    params_f32 = prepare_timestep_embedding_params(
        w1, b1, w2, b2, mxu_dtype=jnp.float32)
    out = jax.block_until_ready(timestep_embedding(t, params_f32))
    assert out.shape == (B, output_dim)
    assert jnp.allclose(out, ref, atol=2e-4, rtol=1e-4), "f32 mismatch vs. reference"

    # ---- bf16 MXU path (default; weights pre-cast once, all generations) ---
    params_bf16 = prepare_timestep_embedding_params(w1, b1, w2, b2)
    out_bf16 = jax.block_until_ready(timestep_embedding(t, params_bf16))
    assert jnp.allclose(out_bf16, ref, atol=5e-3, rtol=5e-2), "bf16 mismatch vs. reference"

    # ---- larger batch exercises the tile picker / >=2-step grid rule -------
    B2 = 48
    t2 = jax.random.uniform(k_t2, (B2,), jnp.float32, minval=0.0, maxval=1000.0)
    ref2 = reference(t2, w1, b1, w2, b2)
    out2 = jax.block_until_ready(timestep_embedding(t2, params_bf16))
    assert out2.shape == (B2, output_dim)
    assert jnp.allclose(out2, ref2, atol=5e-3, rtol=5e-2), "bf16 multi-step mismatch"

    print("KERNEL_OK")
</pallas_src>

<mosaic_0001>
module attributes {stable_mosaic.version = 11 : i64} {
  func.func @timestep_embedding_kernel(%arg0: i32, %arg1: memref<8x1xf32, #tpu.memory_space<vmem>>, %arg2: memref<2x128xf32, #tpu.memory_space<vmem>>, %arg3: memref<128x256xf32, #tpu.memory_space<vmem>>, %arg4: memref<1x256xf32, #tpu.memory_space<vmem>>, %arg5: memref<256x128xf32, #tpu.memory_space<vmem>>, %arg6: memref<1x128xf32, #tpu.memory_space<vmem>>, %arg7: memref<8x128xf32, #tpu.memory_space<vmem>>) attributes {dimension_semantics = [#tpu.dimension_semantics<parallel>], iteration_bounds = array<i64: 1>, scalar_prefetch = 0 : i64, scratch_operands = 0 : i64, tpu.core_type = #tpu.core_type<tc>, window_params = [{transform_indices = @transform_0, window_bounds = array<i64: 8, 1>}, {pipeline_mode = #tpu.pipeline_mode<synchronous>, transform_indices = @transform_1, window_bounds = array<i64: 2, 128>}, {pipeline_mode = #tpu.pipeline_mode<synchronous>, transform_indices = @transform_2, window_bounds = array<i64: 128, 256>}, {pipeline_mode = #tpu.pipeline_mode<synchronous>, transform_indices = @transform_3, window_bounds = array<i64: 1, 256>}, {pipeline_mode = #tpu.pipeline_mode<synchronous>, transform_indices = @transform_4, window_bounds = array<i64: 256, 128>}, {pipeline_mode = #tpu.pipeline_mode<synchronous>, transform_indices = @transform_5, window_bounds = array<i64: 1, 128>}, {transform_indices = @transform_6, window_bounds = array<i64: 8, 128>}]} {
    %c0 = arith.constant 0 : index
    %c0_0 = arith.constant 0 : index
    %0 = vector.load %arg2[%c0, %c0_0] : memref<2x128xf32, #tpu.memory_space<vmem>>, vector<1x128xf32>
    %c1 = arith.constant 1 : index
    %c0_1 = arith.constant 0 : index
    %1 = vector.load %arg2[%c1, %c0_1] : memref<2x128xf32, #tpu.memory_space<vmem>>, vector<1x128xf32>
    %c0_2 = arith.constant 0 : index
    %c0_3 = arith.constant 0 : index
    %2 = vector.load %arg1[%c0_2, %c0_3] : memref<8x1xf32, #tpu.memory_space<vmem>>, vector<8x1xf32>
    %3 = vector.broadcast %2 : vector<8x1xf32> to vector<8x128xf32>
    %4 = vector.broadcast %0 : vector<1x128xf32> to vector<8x128xf32>
    %5 = arith.mulf %3, %4 : vector<8x128xf32>
    %6 = vector.broadcast %1 : vector<1x128xf32> to vector<8x128xf32>
    %7 = arith.addf %5, %6 : vector<8x128xf32>
    %8 = math.sin %7 : vector<8x128xf32>
    %c0_4 = arith.constant 0 : index
    %c0_5 = arith.constant 0 : index
    %9 = vector.load %arg3[%c0_4, %c0_5] : memref<128x256xf32, #tpu.memory_space<vmem>>, vector<128x256xf32>
    %cst = arith.constant dense<0.000000e+00> : vector<8x256xf32>
    %10 = tpu.matmul %8, %9, %cst {dimension_numbers = #tpu.dot_dimension_numbers<[1], [0], [0], [1], [0, 0, 1, 1], [], []>} : vector<8x128xf32>, vector<128x256xf32>, vector<8x256xf32> -> vector<8x256xf32>
    %c0_6 = arith.constant 0 : index
    %c0_7 = arith.constant 0 : index
    %11 = vector.load %arg4[%c0_6, %c0_7] : memref<1x256xf32, #tpu.memory_space<vmem>>, vector<1x256xf32>
    %12 = vector.broadcast %11 : vector<1x256xf32> to vector<8x256xf32>
    %13 = arith.addf %10, %12 : vector<8x256xf32>
    %cst_8 = arith.constant 2.000000e-01 : f32
    %14 = vector.broadcast %cst_8 : f32 to vector<8x256xf32>
    %15 = arith.mulf %14, %13 : vector<8x256xf32>
    %16 = arith.maximumf %13, %15 : vector<8x256xf32>
    %c0_9 = arith.constant 0 : index
    %c0_10 = arith.constant 0 : index
    %17 = vector.load %arg5[%c0_9, %c0_10] : memref<256x128xf32, #tpu.memory_space<vmem>>, vector<256x128xf32>
    %cst_11 = arith.constant dense<0.000000e+00> : vector<8x128xf32>
    %18 = tpu.matmul %16, %17, %cst_11 {dimension_numbers = #tpu.dot_dimension_numbers<[1], [0], [0], [1], [0, 0, 1, 1], [], []>} : vector<8x256xf32>, vector<256x128xf32>, vector<8x128xf32> -> vector<8x128xf32>
    %c0_12 = arith.constant 0 : index
    %c0_13 = arith.constant 0 : index
    %19 = vector.load %arg6[%c0_12, %c0_13] : memref<1x128xf32, #tpu.memory_space<vmem>>, vector<1x128xf32>
    %20 = vector.broadcast %19 : vector<1x128xf32> to vector<8x128xf32>
    %21 = arith.addf %18, %20 : vector<8x128xf32>
    %c0_14 = arith.constant 0 : index
    %c0_15 = arith.constant 0 : index
    %22 = vector.load %arg7[%c0_14, %c0_15] : memref<8x128xf32, #tpu.memory_space<vmem>>, vector<8x128xf32>
    tpu.vector_store %arg7[%c0_14, %c0_15], %21 {strides = array<i32>} : memref<8x128xf32, #tpu.memory_space<vmem>>, vector<8x128xf32>,
    return
  }
  func.func @transform_0(%arg0: i32) -> (i32, i32) {
    %c0_i32 = arith.constant 0 : i32
    %c0_i32_0 = arith.constant 0 : i32
    return %arg0, %c0_i32 : i32, i32
  }
  func.func @transform_1(%arg0: i32) -> (i32, i32) {
    %c0_i32 = arith.constant 0 : i32
    %c0_i32_0 = arith.constant 0 : i32
    %c0_i32_1 = arith.constant 0 : i32
    return %c0_i32, %c0_i32_0 : i32, i32
  }
  func.func @transform_2(%arg0: i32) -> (i32, i32) {
    %c0_i32 = arith.constant 0 : i32
    %c0_i32_0 = arith.constant 0 : i32
    %c0_i32_1 = arith.constant 0 : i32
    return %c0_i32, %c0_i32_0 : i32, i32
  }
  func.func @transform_3(%arg0: i32) -> (i32, i32) {
    %c0_i32 = arith.constant 0 : i32
    %c0_i32_0 = arith.constant 0 : i32
    %c0_i32_1 = arith.constant 0 : i32
    return %c0_i32, %c0_i32_0 : i32, i32
  }
  func.func @transform_4(%arg0: i32) -> (i32, i32) {
    %c0_i32 = arith.constant 0 : i32
    %c0_i32_0 = arith.constant 0 : i32
    %c0_i32_1 = arith.constant 0 : i32
    return %c0_i32, %c0_i32_0 : i32, i32
  }
  func.func @transform_5(%arg0: i32) -> (i32, i32) {
    %c0_i32 = arith.constant 0 : i32
    %c0_i32_0 = arith.constant 0 : i32
    %c0_i32_1 = arith.constant 0 : i32
    return %c0_i32, %c0_i32_0 : i32, i32
  }
  func.func @transform_6(%arg0: i32) -> (i32, i32) {
    %c0_i32 = arith.constant 0 : i32
    %c0_i32_0 = arith.constant 0 : i32
    return %arg0, %c0_i32 : i32, i32
  }
}

</mosaic_0001>

<bundles_post_ra>
// kernel: tpu_custom_call.1
= control target key start
LH: loop header
LB: loop body
LE: loop exit
PB: predicated region body
PF: predicated region fallthrough
CT: control target
= control target key end

     0   :  { %11 = vsyncpa [#allocation3], 0  ;;  %s646_s0 = inlined_call_operand.vmem [shape: f32[8,1], index: 0, kind: input, shape index: {}]   ;;  %s647_s1 = inlined_call_operand.vmem [shape: f32[2,128], index: 1, kind: input, shape index: {}]   ;;  %s648_s2 = inlined_call_operand.hbm [shape: f32[128,256], index: 2, kind: input, shape index: {}]   ;;  %s649_s3 = inlined_call_operand.vmem [shape: f32[1,256], index: 3, kind: input, shape index: {}]   ;;  %s650_s4 = inlined_call_operand.hbm [shape: f32[256,128], index: 4, kind: input, shape index: {}]   ;;  %s651_s5 = inlined_call_operand.vmem [shape: f32[1,128], index: 5, kind: input, shape index: {}]   ;;  %s652_s6 = inlined_call_operand.hbm [shape: f32[8,128], index: 6, kind: output, shape index: {}]  }
   0x1   :  { %12 = vsyncpa [#allocation6], 0 }
   0x2   :  { %13 = vsyncpa [#allocation4], 0  ;;  %s551_s21 = smov [#allocation2]  }
   0x3   :  { %s23_s22 = sshll.u32 %s551_s21, 4  ;;  %s24_s22 = int_to_ptr.vmem [resolvable:$true] %s23_s22 }
   0x4   :  { %s493_s23 = scalar_lea.vmem %s24_s22, 4096  ;;  %p498_p1 = scmp.lt.s32.totalorder %s24_s22, %s24_s22 }
   0x5   :  { %p494_p0 = scmp.ne.s32.totalorder %s24_s22, %s493_s23  ;;  %p499_p2 = scmp.lt.s32.totalorder %s493_s23, %s493_s23 }
   0x7   :  { %p500_p3 = por %p499_p2, %p498_p1 }
   0x9   :  { %p501_p4 = pnand %p500_p3, %p494_p0 }
   0xb   :  { %504 = shalt.err (!%p501_p4)
}
   0xc   :  { %s552_s24 = smov 256   ;;  %s553_s25 = smov 16  }
   0xd   :  { %29 = dma.hbm_to_vmem [thread:$0]  %s648_s2, 4096, %s24_s22, [#allocation3], %s552_s24, %s552_s24, %s553_s25  }
   0xe   :  { %s554_s28 = smov [#allocation5]  }
   0xf   :  { %s37_s29 = sshll.u32 %s554_s28, 4  ;;  %s38_s29 = int_to_ptr.vmem [resolvable:$true] %s37_s29 }
  0x10   :  { %s513_s30 = scalar_lea.vmem %s38_s29, 4096  ;;  %p518_p6 = scmp.lt.s32.totalorder %s38_s29, %s38_s29 }
  0x11   :  { %p514_p5 = scmp.ne.s32.totalorder %s38_s29, %s513_s30  ;;  %p519_p7 = scmp.lt.s32.totalorder %s513_s30, %s513_s30 }
  0x13   :  { %p520_p8 = por %p519_p7, %p518_p6 }
  0x15   :  { %p521_p9 = pnand %p520_p8, %p514_p5 }
  0x17   :  { %524 = shalt.err (!%p521_p9)
}
  0x18   :  { %s555_s7 = smov 128   ;;  %s556_s8 = smov 8  }
  0x19   :  { %43 = dma.hbm_to_vmem [thread:$0]  %s650_s4, 4096, %s38_s29, [#allocation6], %s555_s7, %s555_s7, %s556_s8  }
  0x1a   :  { %545 = dma.done.wait [#allocation3], 4096  }
  0x1b   :  { %546 = vsyncadd [#allocation3], 4294963200 }
  0x1c   :  { %547 = dma.done.wait [#allocation6], 4096  }
  0x1d   :  { %548 = vsyncadd [#allocation6], 4294963200  ;;  %v557_v0 = vmov 0   ;;  %v54_v1 = vld [vmem:[%s646_s0] sm:$0xff]  ;;  %v205_v2 = vld [vmem:[#allocation2 + $0xf8] sm:$0xff]  ;;  %v558_v6 = vmov 0.0  }
  0x1e   :  { %480 = vset.pattern.permute.xlu0 %v557_v0  ;;  %v204_v3 = vld [vmem:[#allocation2 + $0xf0] sm:$0xff]  ;;  %v203_v4 = vld [vmem:[#allocation2 + $0xe8] sm:$0xff]  ;;  %218 = vmatprep.subr.mxu0 %v205_v2  ;;  %v202_v5 = vld [vmem:[#allocation2 + $0xe0] sm:$0xff] }
  0x1f   :  { %57 = vperm.xlu0 %480, %v54_v1   ;;  %282 = vmatprep.mubr.f32.mxu0 %v558_v6  ;;  %v201_v7 = vld [vmem:[#allocation2 + $0xd8] sm:$0xff]  ;;  %v200_v8 = vld [vmem:[#allocation2 + $0xd0] sm:$0xff]  ;;  %v199_v9 = vld [vmem:[#allocation2 + $0xc8] sm:$0xff] }
  0x20   :  { %219 = vmatpush1.msra.mxu0 %v204_v3  ;;  %v198_v10 = vld [vmem:[#allocation2 + $0xc0] sm:$0xff]  ;;  %v197_v11 = vld [vmem:[#allocation2 + $0xb8] sm:$0xff]  ;;  %v196_v12 = vld [vmem:[#allocation2 + $0xb0] sm:$0xff] }
  0x21   :  { %220 = vmatprep.subr.mxu0 %v203_v4  ;;  %v195_v13 = vld [vmem:[#allocation2 + $0xa8] sm:$0xff]  ;;  %v194_v14 = vld [vmem:[#allocation2 + $0xa0] sm:$0xff]  ;;  %v193_v15 = vld [vmem:[#allocation2 + $0x98] sm:$0xff] }
  0x22   :  { %221 = vmatpush1.msra.mxu0 %v202_v5  ;;  %v192_v16 = vld [vmem:[#allocation2 + $0x90] sm:$0xff]  ;;  %v191_v17 = vld [vmem:[#allocation2 + $0x88] sm:$0xff]  ;;  %v190_v18 = vld [vmem:[#allocation2 + $0x80] sm:$0xff] }
  0x23   :  { %222 = vmatprep.subr.mxu0 %v201_v7  ;;  %v189_v19 = vld [vmem:[#allocation2 + $0x78] sm:$0xff]  ;;  %v188_v20 = vld [vmem:[#allocation2 + $0x70] sm:$0xff]  ;;  %v187_v21 = vld [vmem:[#allocation2 + $0x68] sm:$0xff] }
  0x24   :  { %223 = vmatpush1.msra.mxu0 %v200_v8  ;;  %v186_v22 = vld [vmem:[#allocation2 + $0x60] sm:$0xff]  ;;  %v185_v23 = vld [vmem:[#allocation2 + $0x58] sm:$0xff]  ;;  %v184_v24 = vld [vmem:[#allocation2 + $0x50] sm:$0xff] }
  0x25   :  { %224 = vmatprep.subr.mxu0 %v199_v9  ;;  %v183_v25 = vld [vmem:[#allocation2 + $0x48] sm:$0xff]  ;;  %v182_v26 = vld [vmem:[#allocation2 + $0x40] sm:$0xff]  ;;  %v181_v27 = vld [vmem:[#allocation2 + $0x38] sm:$0xff]  ;;  %v559_v9 = vmov 2102212464  }
  0x26   :  { %225 = vmatpush1.msra.mxu0 %v198_v10  ;;  %v180_v28 = vld [vmem:[#allocation2 + $0x30] sm:$0xff]  ;;  %v179_v29 = vld [vmem:[#allocation2 + $0x28] sm:$0xff]  ;;  %v178_v30 = vld [vmem:[#allocation2 + $0x20] sm:$0xff] }
  0x27   :  { %226 = vmatprep.subr.mxu0 %v197_v11  ;;  %v177_v31 = vld [vmem:[#allocation2 + $0x18] sm:$0xff]  ;;  %v176_v32 = vld [vmem:[#allocation2 + $0x10] sm:$0xff]  ;;  %v175_v33 = vld [vmem:[#allocation2 + $0x8] sm:$0xff]  ;;  %v560_v11 = vmov 920167782  }
  0x28   :  { %227 = vmatpush1.msra.mxu0 %v196_v12  ;;  %v174_v34 = vld [vmem:[#allocation2] sm:$0xff]  ;;  %v324_v35 = vld [vmem:[#allocation5 + $0xf8] sm:$0xff]  ;;  %v323_v37 = vld [vmem:[#allocation5 + $0xf0] sm:$0xff] }
  0x29   :  { %228 = vmatprep.subr.mxu0 %v195_v13  ;;  %v308_v36 = vld [vmem:[#allocation5 + $0x78] sm:$0xff]  ;;  %426 = vmatprep.subr.mxu1 %v324_v35  ;;  %v307_v38 = vld [vmem:[#allocation5 + $0x70] sm:$0xff]  ;;  %v322_v39 = vld [vmem:[#allocation5 + $0xe8] sm:$0xff] }
  0x2a   :  { %229 = vmatpush1.msra.mxu0 %v194_v14  ;;  %427 = vmatpush3.msra.mxu1 %v308_v36  ;;  %v306_v40 = vld [vmem:[#allocation5 + $0x68] sm:$0xff]  ;;  %v321_v41 = vld [vmem:[#allocation5 + $0xe0] sm:$0xff]  ;;  %v320_v43 = vld [vmem:[#allocation5 + $0xd8] sm:$0xff] }
  0x2b   :  { %230 = vmatprep.subr.mxu0 %v193_v15  ;;  %428 = vmatprep.subr.mxu1 %v323_v37  ;;  %v305_v42 = vld [vmem:[#allocation5 + $0x60] sm:$0xff]  ;;  %v304_v44 = vld [vmem:[#allocation5 + $0x58] sm:$0xff]  ;;  %v319_v45 = vld [vmem:[#allocation5 + $0xd0] sm:$0xff]  ;;  %v561_v15 = vmov 1326507024  }
  0x2c   :  { %231 = vmatpush1.msra.mxu0 %v192_v16  ;;  %429 = vmatpush3.msra.mxu1 %v307_v38  ;;  %v303_v46 = vld [vmem:[#allocation5 + $0x50] sm:$0xff]  ;;  %v318_v47 = vld [vmem:[#allocation5 + $0xc8] sm:$0xff]  ;;  %v317_v49 = vld [vmem:[#allocation5 + $0xc0] sm:$0xff] }
  0x2d   :  { %232 = vmatprep.subr.mxu0 %v191_v17  ;;  %430 = vmatprep.subr.mxu1 %v322_v39  ;;  %v302_v48 = vld [vmem:[#allocation5 + $0x48] sm:$0xff]  ;;  %v301_v50 = vld [vmem:[#allocation5 + $0x40] sm:$0xff]  ;;  %v316_v51 = vld [vmem:[#allocation5 + $0xb8] sm:$0xff]  ;;  %v562_v17 = vmov 683565275  }
  0x2e   :  { %233 = vmatpush1.msra.mxu0 %v190_v18  ;;  %431 = vmatpush3.msra.mxu1 %v306_v40  ;;  %v300_v52 = vld [vmem:[#allocation5 + $0x38] sm:$0xff]  ;;  %v315_v53 = vld [vmem:[#allocation5 + $0xb0] sm:$0xff]  ;;  %v314_v55 = vld [vmem:[#allocation5 + $0xa8] sm:$0xff] }
  0x2f   :  { %234 = vmatprep.subr.mxu0 %v189_v19  ;;  %432 = vmatprep.subr.mxu1 %v321_v41  ;;  %v299_v54 = vld [vmem:[#allocation5 + $0x30] sm:$0xff]  ;;  %v298_v56 = vld [vmem:[#allocation5 + $0x28] sm:$0xff]  ;;  %v419_v57 = vld [vmem:[%s647_s1] ss:$0 sm:$0xff]  ;;  %v563_v19 = vmov 2475754826  }
  0x30   :  { %235 = vmatpush1.msra.mxu0 %v188_v20  ;;  %433 = vmatpush3.msra.mxu1 %v305_v42  ;;  %v420_v59 = vld [vmem:[%s647_s1 + $0x1] ss:$0 sm:$0xff] }
  0x31   :  { %236 = vmatprep.subr.mxu0 %v187_v21  ;;  %434 = vmatprep.subr.mxu1 %v320_v43 }
  0x32   :  { %237 = vmatpush1.msra.mxu0 %v186_v22  ;;  %435 = vmatpush3.msra.mxu1 %v304_v44  ;;  %v564_v22 = vmov 2131351028  }
  0x33   :  { %238 = vmatprep.subr.mxu0 %v185_v23  ;;  %436 = vmatprep.subr.mxu1 %v319_v45 }
  0x34   :  { %239 = vmatpush1.msra.mxu0 %v184_v24  ;;  %437 = vmatpush3.msra.mxu1 %v303_v46 }
  0x35   :  { %240 = vmatprep.subr.mxu0 %v183_v25  ;;  %438 = vmatprep.subr.mxu1 %v318_v47 }
  0x36   :  { %241 = vmatpush1.msra.mxu0 %v182_v26  ;;  %439 = vmatpush3.msra.mxu1 %v302_v48 }
  0x37   :  { %242 = vmatprep.subr.mxu0 %v181_v27  ;;  %440 = vmatprep.subr.mxu1 %v317_v49 }
  0x38   :  { %243 = vmatpush1.msra.mxu0 %v180_v28  ;;  %441 = vmatpush3.msra.mxu1 %v301_v50 }
  0x39   :  { %244 = vmatprep.subr.mxu0 %v179_v29  ;;  %442 = vmatprep.subr.mxu1 %v316_v51 }
  0x3a   :  { %245 = vmatpush1.msra.mxu0 %v178_v30  ;;  %443 = vmatpush3.msra.mxu1 %v300_v52 }
  0x3b   :  { %246 = vmatprep.subr.mxu0 %v177_v31  ;;  %444 = vmatprep.subr.mxu1 %v315_v53 }
  0x3c   :  { %247 = vmatpush1.msra.mxu0 %v176_v32  ;;  %445 = vmatpush3.msra.mxu1 %v299_v54 }
  0x3d   :  { %248 = vmatprep.subr.mxu0 %v175_v33  ;;  %446 = vmatprep.subr.mxu1 %v314_v55 }
  0x3e   :  { %249 = vmatpush1.msra.mxu0 %v174_v34  ;;  %447 = vmatpush3.msra.mxu1 %v298_v56 }
  0x9a   :  { %v58_v58 = vpop.permute.xlu0 %57 }
  0x9b   :  { %v64_v60 = vmul.f32 %v419_v57, %v58_v58 }
  0x9d   :  { %v616_v61 = vadd.f32 %v420_v59, %v64_v60 }
  0x9f   :  { %v73_v62 = vand.u32 2139095040, %v616_v61  ;;  %v70_v63 = vand.u32 2147483647, %v616_v61  ;;  %vm72_vm7 = vcmp.lt.s32.totalorder %v616_v61, 0  ;;  %vm162_vm12 = vweird.f32 %v616_v61 }
  0xa1   :  { %v74_v0 = vshrl.u32 %v73_v62, 23  ;;  %v77_v2 = vand.u32 8388607, %v70_v63  ;;  %vm71_vm8 = vcmp.le.f32.partialorder %v70_v63, 0.7853982 }
  0xa3   :  { %v421_v1 = vadd.s32 4294967169, %v74_v0  ;;  %v78_v5 = vor.u32 8388608, %v77_v2 }
  0xa5   :  { %v80_v3 = vadd.s32 1, %v421_v1  ;;  %v118_v13 = vshll.u32 %v78_v5, 8 }
  0xa7   :  { %vm81_vm0 = vcmp.gt.s32.totalorder %v80_v3, 0 }
  0xa8   :  { %v82_v4 = vsel %vm81_vm0, %v80_v3, 0 }
  0xa9   :  { %v84_v6 = vand.u32 31, %v82_v4  ;;  %v83_v7 = vshrl.u32 %v82_v4, 5 }
  0xab   :  { %v85_v8 = vsub.s32 32, %v84_v6  ;;  %v96_v10 = vshll.u32 %v559_v9, %v84_v6  ;;  %v99_v12 = vshll.u32 %v560_v11, %v84_v6  ;;  %v87_v18 = vshll.u32 %v562_v17, %v84_v6 }
  0xac   :  { %v90_v21 = vshll.u32 %v563_v19, %v84_v6  ;;  %v93_v24 = vshll.u32 %v564_v22, %v84_v6  ;;  %vm105_vm1 = vcmp.lt.s32.totalorder %v83_v7, 4  ;;  %vm102_vm2 = vcmp.lt.s32.totalorder %v83_v7, 1 }
  0xad   :  { %v97_v14 = vshrl.u32 %v560_v11, %v85_v8  ;;  %v100_v16 = vshrl.u32 %v561_v15, %v85_v8  ;;  %v88_v20 = vshrl.u32 %v563_v19, %v85_v8  ;;  %v91_v23 = vshrl.u32 %v564_v22, %v85_v8 }
  0xae   :  { %v94_v25 = vshrl.u32 %v559_v9, %v85_v8  ;;  %v86_v29 = vshrl.u32 %v562_v17, %v85_v8  ;;  %vm103_vm3 = vcmp.lt.s32.totalorder %v83_v7, 2  ;;  %vm104_vm4 = vcmp.lt.s32.totalorder %v83_v7, 3 }
  0xaf   :  { %v98_v26 = vor.u32 %v97_v14, %v96_v10  ;;  %v101_v27 = vor.u32 %v100_v16, %v99_v12  ;;  %v89_v28 = vor.u32 %v88_v20, %v87_v18  ;;  %v92_v30 = vor.u32 %v91_v23, %v90_v21 }
  0xb0   :  { %v95_v31 = vor.u32 %v94_v25, %v93_v24 }
  0xb1   :  { %v111_v32 = vsel %vm105_vm1, %v98_v26, 920167782  ;;  %v115_v33 = vsel %vm105_vm1, %v101_v27, 1326507024  ;;  %v110_v35 = vsel %vm102_vm2, %v89_v28, %v92_v30  ;;  %v106_v38 = vsel %vm102_vm2, %v86_v29, %v89_v28  ;;  %v297_v27 = vld [vmem:[#allocation5 + $0x20] sm:$0xff]  ;;  %v312_v28 = vld [vmem:[#allocation5 + $0x98] sm:$0xff] }
  0xb2   :  { %v107_v34 = vsel %vm105_vm1, %v95_v31, 2102212464  ;;  %v112_v36 = vsel %vm104_vm4, %v95_v31, %v111_v32  ;;  %v114_v37 = vsel %vm102_vm2, %v92_v30, %v95_v31  ;;  %v116_v41 = vsel %vm104_vm4, %v98_v26, %v115_v33  ;;  %v313_v26 = vld [vmem:[#allocation5 + $0xa0] sm:$0xff]  ;;  %v296_v29 = vld [vmem:[#allocation5 + $0x18] sm:$0xff]  ;;  %v295_v31 = vld [vmem:[#allocation5 + $0x10] sm:$0xff] }
  0xb3   :  { %v108_v39 = vsel %vm104_vm4, %v92_v30, %v107_v34  ;;  %v113_v40 = vsel %vm103_vm3, %v110_v35, %v112_v36  ;;  %v117_v42 = vsel %vm103_vm3, %v114_v37, %v116_v41  ;;  %448 = vmatprep.subr.mxu1 %v313_v26  ;;  %v311_v30 = vld [vmem:[#allocation5 + $0x90] sm:$0xff]  ;;  %v310_v32 = vld [vmem:[#allocation5 + $0x88] sm:$0xff]  ;;  %v309_v34 = vld [vmem:[#allocation5 + $0x80] sm:$0xff]  ;;  %v208_v35 = vlaneseq }
  0xb4   :  { %v622_v43 = vmul.u32.u64.low %v118_v13, %v113_v40  ;;  %v623_v44 = vmul.u32.u64.high %v118_v13, %v113_v40, %v622_v43  ;;  %v625_v45 = vmul.u32.u64.low %v118_v13, %v117_v42  ;;  %v626_v46 = vmul.u32.u64.high %v118_v13, %v117_v42, %v625_v45  ;;  %449 = vmatpush3.msra.mxu1 %v297_v27  ;;  %v294_v33 = vld [vmem:[#allocation5 + $0x8] sm:$0xff] }
  0xb5   :  { %v109_v47 = vsel %vm103_vm3, %v106_v38, %v108_v39  ;;  %450 = vmatprep.subr.mxu1 %v312_v28  ;;  %v209_v36 = vshrl.u32 %v208_v35, 7  ;;  %v206_v38 = vld [vmem:[%s649_s3] sm:$0x3]  ;;  %s565_s3 = smov [#allocation7]  }
  0xb6   :  { %v128_v48 = vadd.s32 1, %v623_v44  ;;  %v125_v49 = vmul.u32 %v118_v13, %v109_v47  ;;  %vm127_vm5 = vc.u32 %v626_v46, %v622_v43  ;;  %v126_v62 = vadd.s32 %v622_v43, %v626_v46  ;;  %451 = vmatpush3.msra.mxu1 %v296_v29  ;;  %s409_s17 = sshll.u32 %s565_s3, 4  ;;  %s410_s17 = int_to_ptr.vmem [resolvable:$true] %s409_s17 }
  0xb7   :  { %452 = vmatprep.subr.mxu1 %v311_v30  ;;  %v210_v37 = vsub.s32 0, %v209_v36  ;;  %v214_v39 = vsub.s32 1, %v209_v36  ;;  %s525_s18 = scalar_lea.vmem %s410_s17, 128  ;;  %p530_p11 = scmp.lt.s32.totalorder %s410_s17, %s410_s17 }
  0xb8   :  { %v129_v50 = vsel %vm127_vm5, %v128_v48, %v623_v44  ;;  %453 = vmatpush3.msra.mxu1 %v295_v31  ;;  %p526_p10 = scmp.ne.s32.totalorder %s410_s17, %s525_s18  ;;  %p531_p12 = scmp.lt.s32.totalorder %s525_s18, %s525_s18 }
  0xb9   :  { %v130_v51 = vadd.s32 %v129_v50, %v125_v49  ;;  %454 = vmatprep.subr.mxu1 %v310_v32  ;;  %v211_v40 = vrot.slane %v206_v38, %v210_v37  ;;  %v215_v41 = vrot.slane %v206_v38, %v214_v39 }
  0xba   :  { %455 = vmatpush3.msra.mxu1 %v294_v33  ;;  %p532_p13 = por %p531_p12, %p530_p11 }
  0xbb   :  { %v131_v52 = vadd.s32 536870912, %v130_v51  ;;  %456 = vmatprep.subr.mxu1 %v309_v34 }
  0xbc   :  { %p533_p0 = pnand %p532_p13, %p526_p10 }
  0xbd   :  { %v132_v53 = vshrl.u32 %v131_v52, 30 }
  0xbf   :  { %v133_v54 = vshll.u32 %v132_v53, 30  ;;  %v156_v12 = vsub.s32 4, %v132_v53 }
  0xc1   :  { %v134_v55 = vsub.s32 %v130_v51, %v133_v54  ;;  %v157_v15 = vsel %vm72_vm7, %v156_v12, %v132_v53  ;;  %v425_v51 = vld [vmem:[%s651_s5] ss:$0 sm:$0xff] }
  0xc2   :  { %v159_v16 = vsel %vm71_vm8, 0, %v157_v15 }
  0xc3   :  { %v136_v56 = vsub.s32 0, %v134_v55  ;;  %v163_v17 = vadd.s32 3, %v159_v16 }
  0xc5   :  { %v422_v57 = vmin.u32 %v136_v56, %v134_v55  ;;  %v164_v18 = vand.u32 3, %v163_v17 }
  0xc7   :  { %v138_v58 = vclz %v422_v57  ;;  %vm169_vm9 = vcmp.eq.s32.totalorder %v164_v18, 2  ;;  %vm166_vm10 = vcmp.eq.s32.totalorder %v164_v18, 0  ;;  %vm165_vm11 = vcmp.lt.s32.totalorder %v164_v18, 2 }
  0xc9   :  { %v423_v59 = vadd.s32 4294967294, %v138_v58 }
  0xcb   :  { %vm424_vm6 = vcmp.lt.s32.totalorder %v423_v59, 0 }
  0xcc   :  { %v141_v60 = vsel %vm424_vm6, 0, %v423_v59 }
  0xcd   :  { %v142_v0 = vsub.s32 32, %v141_v60  ;;  %v146_v1 = vsub.s32 4294967266, %v141_v60  ;;  %v143_v2 = vshll.u32 %v134_v55, %v141_v60 }
  0xcf   :  { %v144_v3 = vshrl.u32 %v126_v62, %v142_v0  ;;  %v147_v4 = vadd.s32 127, %v146_v1 }
  0xd1   :  { %v145_v5 = vor.u32 %v144_v3, %v143_v2  ;;  %v148_v6 = vshll.u32 %v147_v4, 23 }
  0xd3   :  { %v149_v7 = vor.u32 4788187, %v148_v6  ;;  %v152_v9 = vcvt.s32.f32 %v145_v5 }
  0xd5   :  { %v150_v8 = vand.u32 2147483647, %v149_v7 }
  0xd7   :  { %v153_v10 = vmul.f32 %v152_v9, %v150_v8 }
  0xd9   :  { %v154_v11 = vxor.u32 2147483648, %v153_v10 }
  0xdb   :  { %v155_v13 = vsel %vm72_vm7, %v154_v11, %v153_v10 }
  0xdc   :  { %v158_v14 = vsel %vm71_vm8, %v616_v61, %v155_v13  ;;  %v293_v61 = vld [vmem:[#allocation5] sm:$0xff] }
  0xdd   :  { %481 = vcosq.f32 %v158_v14  ;;  %457 = vmatpush3.msra.mxu1 %v293_v61 }
  0xde   :  { %483 = vsinq.f32 %v158_v14 }
  0xea   :  { %v482_v19 = vpop.eup %481 }
  0xeb   :  { %v484_v20 = vpop.eup %483  ;;  %v170_v21 = vxor.u32 2147483648, %v482_v19 }
  0xec   :  { %v167_v22 = vxor.u32 2147483648, %v484_v20 }
  0xed   :  { %v171_v23 = vsel %vm169_vm9, %v170_v21, %v484_v20 }
  0xee   :  { %v168_v24 = vsel %vm166_vm10, %v482_v19, %v167_v22 }
  0xef   :  { %v172_v63 = vsel %vm165_vm11, %v168_v24, %v171_v23 }
  0xf0   :  { %v173_v25 = vsel %vm162_vm12, nan, %v172_v63 }
  0xf1   :  { %283 = vmatmul.mubr.f32.vlgmr.msra.gmra.mxu0 %v173_v25 }
 0x1b1   :  { %v284_v42 = vpop.f32.mrf.mxu0 }
 0x1b2   :  { %v285_v43 = vadd.f32 %v284_v42, %v211_v40 }
 0x1b3   :  { %v286_v44 = vpop.f32.mrf.mxu0 }
 0x1b4   :  { %v287_v45 = vadd.f32 %v286_v44, %v215_v41  ;;  %v289_v46 = vmul.f32 0.2, %v285_v43 }
 0x1b6   :  { %v290_v47 = vmul.f32 0.2, %v287_v45  ;;  %v291_v49 = vmax.f32 %v285_v43, %v289_v46 }
 0x1b8   :  { %v292_v48 = vmax.f32 %v287_v45, %v290_v47 }
 0x1ba   :  { %396 = vmatprep.mubr.f32.mxu1 %v292_v48 }
 0x1bb   :  { %397 = vmatmul.mubr.f32.vlgmr.msra.gmra.mxu1 %v291_v49 }
 0x27b   :  { %v458_v50 = vpop.f32.mrf.mxu1 }
 0x27d   :  { %v459_v52 = vpop.f32.mrf.mxu1 }
 0x27e   :  { %v460_v53 = vadd.f32 %v459_v52, %v458_v50 }
 0x280   :  { %v399_v54 = vadd.f32 %v460_v53, %v425_v51 }
 0x282   :  { %402 = vst [vmem:[#allocation7] sm:$0xff] %v399_v54 }
 0x283   :  { %536 = shalt.err (!%p533_p0)
}
 0x284   :  { %412 = dma.vmem_to_hbm [thread:$0]  %s410_s17, 128, %s652_s6, [#allocation4]  }
 0x285   :  { %549 = dma.done.wait [#allocation4], 128  }
 0x286   :  { %550 = vsyncadd [#allocation4], 4294967168 }
 0x287   :  { %416 = vsyncpa [#allocation3], 1 }
 0x288   :  { %417 = vsyncpa [#allocation6], 1 }
 0x289   :  { %418 = vsyncpa [#allocation4], 1 }

</bundles_post_ra>
